<compile_context>
chip_gen: v5e
topology: v5e:2x2
jax: 0.10.0
libtpu: 0.0.40
codegen_flags: <defaults>
</compile_context>

<pallas_src>
import functools

import jax
import jax.numpy as jnp
from jax import lax
from jax.experimental import pallas as pl
from jax.experimental.pallas import tpu as pltpu

_LANE = 128


def _resident_spec(shape):
    """Constant-index (VMEM-resident) block; single-buffered when supported."""
    index_map = lambda i: (0,) * len(shape)
    if hasattr(pl, "Buffered"):
        try:
            return pl.BlockSpec(shape, index_map, pipeline_mode=pl.Buffered(1))
        except TypeError:  # older signature without pipeline_mode
            pass
    return pl.BlockSpec(shape, index_map)


def meta_embedding_kernel(Cp, x_ref, wcat_ref, bias_ref, cent_ref, ew_ref,
                          logits_ref, infused_ref):
    x = x_ref[...]                                     # (TB, Fp) f32
    xb = x.astype(jnp.bfloat16)

    # ---- single fused MXU matmul in native (K, N) layout --------------------
    #   big = x @ [ -2*centroids | W_hall | W_sel ]^T + [c_sq | b_hall | b_sel]
    big = jnp.dot(xb, wcat_ref[...], preferred_element_type=jnp.float32)
    big = big + bias_ref[...]                          # (TB, 2Cp+Fp)

    # ---- nearest-centroid distance -> reachability ---------------------------
    # torch sorts all distances but only uses the minimum -> min reduction.
    x_sq = jnp.sum(x * x, axis=1, keepdims=True)       # (TB, 1)
    dist2 = x_sq + big[:, :Cp]                         # ||x||^2 - 2 x.c + ||c||^2
    min_d2 = jnp.maximum(jnp.min(dist2, axis=1, keepdims=True), 1e-12)
    reach = 10.0 * lax.rsqrt(min_d2)                   # (TB, 1)

    # ---- hallucinator softmax over classes -----------------------------------
    hall = big[:, Cp:2 * Cp]
    vm = jnp.exp(hall - jnp.max(hall, axis=1, keepdims=True))
    vm = vm * pl.reciprocal(jnp.sum(vm, axis=1, keepdims=True), approx=True)

    # ---- memory mixing + concept selector -------------------------------------
    mem = jnp.dot(vm.astype(jnp.bfloat16), cent_ref[...],
                  preferred_element_type=jnp.float32)  # (TB, Fp)
    sel = jnp.tanh(big[:, 2 * Cp:])                    # (TB, Fp)
    infused = sel * mem
    x_new = reach * (x + infused)

    # ---- CosNorm classifier: (||x||/(1+||x||)) * x/||x|| == x/(1+||x||) ------
    norm_x = jnp.sqrt(jnp.sum(x_new * x_new, axis=1, keepdims=True))
    scale = 16.0 * pl.reciprocal(1.0 + norm_x, approx=True)
    logits = jnp.dot((scale * x_new).astype(jnp.bfloat16), ew_ref[...],
                     preferred_element_type=jnp.float32)

    logits_ref[...] = logits
    infused_ref[...] = infused


def meta_embedding_forward(x, centroids, w_hall, b_hall, w_sel, b_sel, w_cos,
                           *, block_b=512):
    x_in = x                      # direct_feature returned untouched
    B, F = x.shape
    C = centroids.shape[0]

    xf = x.astype(jnp.float32)
    cent = centroids.astype(jnp.float32)
    w_hall = w_hall.astype(jnp.float32)
    b_hall = b_hall.astype(jnp.float32)
    w_sel = w_sel.astype(jnp.float32)
    b_sel = b_sel.astype(jnp.float32)
    w_cos = w_cos.astype(jnp.float32)

    # ---- batch-independent weight prep (hoisted out of the kernel) -----------
    c_sq = jnp.sum(cent * cent, axis=1)                                    # (C,)
    ew = w_cos * lax.rsqrt(jnp.sum(w_cos * w_cos, axis=1, keepdims=True))  # (C,F)

    # ---- pad feature / class dims to lane width (128) ------------------------
    pf = (-F) % _LANE
    pc = (-C) % _LANE
    Fp, Cp = F + pf, C + pc
    if pf:
        xf = jnp.pad(xf, ((0, 0), (0, pf)))
        cent = jnp.pad(cent, ((0, 0), (0, pf)))
        w_hall = jnp.pad(w_hall, ((0, 0), (0, pf)))
        w_sel = jnp.pad(w_sel, ((0, pf), (0, pf)))
        b_sel = jnp.pad(b_sel, (0, pf))
        ew = jnp.pad(ew, ((0, 0), (0, pf)))
    if pc:
        cent = jnp.pad(cent, ((0, pc), (0, 0)))
        w_hall = jnp.pad(w_hall, ((0, pc), (0, 0)))
        b_hall = jnp.pad(b_hall, (0, pc), constant_values=-1e30)  # mask softmax
        c_sq = jnp.pad(c_sq, (0, pc), constant_values=1e30)       # never nearest
        ew = jnp.pad(ew, ((0, pc), (0, 0)))                       # zero logits

    # ---- batch tiling: >=4 tiles when possible, TB multiple of 8, <=block_b --
    B8 = ((B + 7) // 8) * 8
    tb_cap = max(8, ((-(-B8 // 4)) + 7) // 8 * 8)    # ceil(B8/4) rounded up to 8
    TB = int(min(block_b, tb_cap, B8))
    Bp = ((B + TB - 1) // TB) * TB
    if Bp != B:
        xf = jnp.pad(xf, ((0, Bp - B), (0, 0)))
    grid = (Bp // TB,)

    # ---- bf16 MXU operands in native (K, N) layout, prepared once ------------
    N = 2 * Cp + Fp
    w_cat_t = jnp.concatenate([-2.0 * cent, w_hall, w_sel], axis=0)
    w_cat_t = w_cat_t.T.astype(jnp.bfloat16)                         # (Fp, N)
    cent_bf = cent.astype(jnp.bfloat16)                              # (Cp, Fp)
    ew_t = ew.T.astype(jnp.bfloat16)                                 # (Fp, Cp)
    bias_cat = jnp.concatenate([c_sq, b_hall, b_sel]).reshape(1, N)
    bias_cat = bias_cat.astype(jnp.float32)

    # ---- cost estimate & generation-aware VMEM budget -------------------------
    flops = 2 * Bp * Fp * (N + 2 * Cp)
    transcendentals = Bp * (Cp + Fp + 4)
    weight_bytes = 2 * (Fp * N + Cp * Fp + Fp * Cp) + 4 * N
    bytes_accessed = 4 * Bp * (2 * Fp + Cp) + weight_bytes
    cost = pl.CostEstimate(flops=flops, transcendentals=transcendentals,
                           bytes_accessed=bytes_accessed)

    tile_bytes = 2 * 4 * TB * (2 * Fp + Cp)      # double-buffered x/logits/infused
    try:
        vmem_cap = int(pltpu.get_tpu_info().vmem_capacity_bytes)
    except Exception:
        vmem_cap = 64 * 1024 * 1024              # conservative (v7x)
    vmem_hi = (vmem_cap * 7) // 8                # ~56 MiB on v7x, ~112 MiB v5e/v6e
    vmem_limit = int(min(max(weight_bytes + tile_bytes + (4 << 20), 16 << 20),
                         vmem_hi))

    kernel = functools.partial(meta_embedding_kernel, Cp)
    logits_p, infused_p = pl.pallas_call(
        kernel,
        out_shape=(jax.ShapeDtypeStruct((Bp, Cp), jnp.float32),
                   jax.ShapeDtypeStruct((Bp, Fp), jnp.float32)),
        grid=grid,
        in_specs=[
            pl.BlockSpec((TB, Fp), lambda i: (i, 0)),   # x tile (streamed)
            _resident_spec((Fp, N)),                     # W_cat^T  (bf16, resident)
            _resident_spec((1, N)),                      # [c_sq | b_hall | b_sel]
            _resident_spec((Cp, Fp)),                    # centroids (bf16)
            _resident_spec((Fp, Cp)),                    # normalized cos W^T (bf16)
        ],
        out_specs=(pl.BlockSpec((TB, Cp), lambda i: (i, 0)),
                   pl.BlockSpec((TB, Fp), lambda i: (i, 0))),
        compiler_params=pltpu.CompilerParams(
            dimension_semantics=("parallel",),
            vmem_limit_bytes=vmem_limit),
        cost_estimate=cost,
    )(xf, w_cat_t, bias_cat, cent_bf, ew_t)

    logits = logits_p[:B, :C]
    infused = infused_p[:B, :F]
    # matches torch return: (logits, [direct_feature, infused_feature])
    return logits, [x_in, infused]


def _reference(x, centroids, w_hall, b_hall, w_sel, b_sel, w_cos):
    # pure-JAX f32 reference mirroring the PyTorch forward (including the sort)
    diff = x[:, None, :] - centroids[None, :, :]
    dist = jnp.linalg.norm(diff, axis=2)
    values_nn = jnp.sort(dist, axis=1)
    reach = (10.0 / values_nn[:, 0])[:, None]
    vm = jax.nn.softmax(x @ w_hall.T + b_hall, axis=1)
    mem = vm @ centroids
    sel = jnp.tanh(x @ w_sel.T + b_sel)
    infused = sel * mem
    x_new = reach * (x + infused)
    norm_x = jnp.linalg.norm(x_new, axis=1, keepdims=True)
    ex = (norm_x / (1 + norm_x)) * (x_new / norm_x)
    ew = w_cos / jnp.linalg.norm(w_cos, axis=1, keepdims=True)
    return (16.0 * ex) @ ew.T, infused


if __name__ == "__main__":
    # small synthetic sizes: odd batch + non-128 class count exercise the
    # padding / multi-tile paths; F stays lane-aligned.
    B, F, C = 13, 128, 96
    key = jax.random.PRNGKey(0)
    ks = jax.random.split(key, 7)
    bound = float(1.0 / (F ** 0.5))

    x = jax.random.normal(ks[0], (B, F), jnp.float32)
    centroids = jax.random.normal(ks[1], (C, F), jnp.float32)
    w_hall = jax.random.uniform(ks[2], (C, F), jnp.float32, -bound, bound)
    b_hall = jax.random.uniform(ks[3], (C,), jnp.float32, -bound, bound)
    w_sel = jax.random.uniform(ks[4], (F, F), jnp.float32, -bound, bound)
    b_sel = jax.random.uniform(ks[5], (F,), jnp.float32, -bound, bound)
    w_cos = jax.random.uniform(ks[6], (C, F), jnp.float32, -bound, bound)

    logits, (direct, infused) = meta_embedding_forward(
        x, centroids, w_hall, b_hall, w_sel, b_sel, w_cos)
    jax.block_until_ready((logits, direct, infused))

    ref_logits, ref_infused = _reference(
        x, centroids, w_hall, b_hall, w_sel, b_sel, w_cos)

    # bf16 MXU operands + approx reciprocals -> slightly looser tolerances
    assert logits.shape == (B, C) and infused.shape == (B, F)
    assert jnp.allclose(logits, ref_logits, atol=5e-2, rtol=5e-2), \
        float(jnp.max(jnp.abs(logits - ref_logits)))
    assert jnp.allclose(infused, ref_infused, atol=1e-2, rtol=1e-2), \
        float(jnp.max(jnp.abs(infused - ref_infused)))
    assert jnp.array_equal(direct, x)

    print("KERNEL_OK")
</pallas_src>

<mosaic_0001>
module attributes {stable_mosaic.version = 11 : i64} {
  func.func @meta_embedding_kernel(%arg0: i32, %arg1: memref<8x128xf32, #tpu.memory_space<vmem>>, %arg2: memref<128x384xbf16, #tpu.memory_space<vmem>>, %arg3: memref<1x384xf32, #tpu.memory_space<vmem>>, %arg4: memref<128x128xbf16, #tpu.memory_space<vmem>>, %arg5: memref<128x128xbf16, #tpu.memory_space<vmem>>, %arg6: memref<8x128xf32, #tpu.memory_space<vmem>>, %arg7: memref<8x128xf32, #tpu.memory_space<vmem>>) attributes {dimension_semantics = [#tpu.dimension_semantics<parallel>], iteration_bounds = array<i64: 2>, scalar_prefetch = 0 : i64, scratch_operands = 0 : i64, tpu.core_type = #tpu.core_type<tc>, window_params = [{transform_indices = @transform_0, window_bounds = array<i64: 8, 128>}, {pipeline_mode = #tpu.pipeline_mode<synchronous>, transform_indices = @transform_1, window_bounds = array<i64: 128, 384>}, {pipeline_mode = #tpu.pipeline_mode<synchronous>, transform_indices = @transform_2, window_bounds = array<i64: 1, 384>}, {pipeline_mode = #tpu.pipeline_mode<synchronous>, transform_indices = @transform_3, window_bounds = array<i64: 128, 128>}, {pipeline_mode = #tpu.pipeline_mode<synchronous>, transform_indices = @transform_4, window_bounds = array<i64: 128, 128>}, {transform_indices = @transform_5, window_bounds = array<i64: 8, 128>}, {transform_indices = @transform_6, window_bounds = array<i64: 8, 128>}]} {
    %c0 = arith.constant 0 : index
    %c0_0 = arith.constant 0 : index
    %0 = vector.load %arg1[%c0, %c0_0] : memref<8x128xf32, #tpu.memory_space<vmem>>, vector<8x128xf32>
    %1 = arith.truncf %0 : vector<8x128xf32> to vector<8x128xbf16>
    %c0_1 = arith.constant 0 : index
    %c0_2 = arith.constant 0 : index
    %2 = vector.load %arg2[%c0_1, %c0_2] : memref<128x384xbf16, #tpu.memory_space<vmem>>, vector<128x384xbf16>
    %cst = arith.constant dense<0.000000e+00> : vector<8x384xf32>
    %3 = tpu.matmul %1, %2, %cst {dimension_numbers = #tpu.dot_dimension_numbers<[1], [0], [0], [1], [0, 0, 1, 1], [], []>} : vector<8x128xbf16>, vector<128x384xbf16>, vector<8x384xf32> -> vector<8x384xf32>
    %c0_3 = arith.constant 0 : index
    %c0_4 = arith.constant 0 : index
    %4 = vector.load %arg3[%c0_3, %c0_4] : memref<1x384xf32, #tpu.memory_space<vmem>>, vector<1x384xf32>
    %5 = vector.broadcast %4 : vector<1x384xf32> to vector<8x384xf32>
    %6 = arith.addf %3, %5 : vector<8x384xf32>
    %7 = arith.mulf %0, %0 : vector<8x128xf32>
    %cst_5 = arith.constant dense<0.000000e+00> : vector<8xf32>
    %8 = vector.multi_reduction <add>, %7, %cst_5 [1] : vector<8x128xf32> to vector<8xf32>
    %9 = vector.shape_cast %8 : vector<8xf32> to vector<8x1xf32>
    %10 = vector.extract_strided_slice %6 {offsets = [0, 0], sizes = [8, 128], strides = [1, 1]} : vector<8x384xf32> to vector<8x128xf32>
    %11 = vector.broadcast %9 : vector<8x1xf32> to vector<8x128xf32>
    %12 = arith.addf %11, %10 : vector<8x128xf32>
    %cst_6 = arith.constant dense<0x7F800000> : vector<8xf32>
    %13 = vector.multi_reduction <minimumf>, %12, %cst_6 [1] : vector<8x128xf32> to vector<8xf32>
    %14 = vector.shape_cast %13 : vector<8xf32> to vector<8x1xf32>
    %cst_7 = arith.constant 9.99999996E-13 : f32
    %15 = vector.broadcast %cst_7 : f32 to vector<8x1xf32>
    %16 = arith.maximumf %14, %15 : vector<8x1xf32>
    %17 = math.rsqrt %16 : vector<8x1xf32>
    %cst_8 = arith.constant 1.000000e+01 : f32
    %18 = vector.broadcast %cst_8 : f32 to vector<8x1xf32>
    %19 = arith.mulf %18, %17 : vector<8x1xf32>
    %20 = vector.extract_strided_slice %6 {offsets = [0, 128], sizes = [8, 128], strides = [1, 1]} : vector<8x384xf32> to vector<8x128xf32>
    %cst_9 = arith.constant dense<0xFF800000> : vector<8xf32>
    %21 = vector.multi_reduction <maximumf>, %20, %cst_9 [1] : vector<8x128xf32> to vector<8xf32>
    %22 = vector.shape_cast %21 : vector<8xf32> to vector<8x1xf32>
    %23 = vector.broadcast %22 : vector<8x1xf32> to vector<8x128xf32>
    %24 = arith.subf %20, %23 : vector<8x128xf32>
    %25 = math.exp %24 : vector<8x128xf32>
    %cst_10 = arith.constant dense<0.000000e+00> : vector<8xf32>
    %26 = vector.multi_reduction <add>, %25, %cst_10 [1] : vector<8x128xf32> to vector<8xf32>
    %27 = vector.shape_cast %26 : vector<8xf32> to vector<8x1xf32>
    %28 = tpu.reciprocal %27 {approx = true} : vector<8x1xf32> -> vector<8x1xf32>
    %29 = vector.broadcast %28 : vector<8x1xf32> to vector<8x128xf32>
    %30 = arith.mulf %25, %29 : vector<8x128xf32>
    %31 = arith.truncf %30 : vector<8x128xf32> to vector<8x128xbf16>
    %c0_11 = arith.constant 0 : index
    %c0_12 = arith.constant 0 : index
    %32 = vector.load %arg4[%c0_11, %c0_12] : memref<128x128xbf16, #tpu.memory_space<vmem>>, vector<128x128xbf16>
    %cst_13 = arith.constant dense<0.000000e+00> : vector<8x128xf32>
    %33 = tpu.matmul %31, %32, %cst_13 {dimension_numbers = #tpu.dot_dimension_numbers<[1], [0], [0], [1], [0, 0, 1, 1], [], []>} : vector<8x128xbf16>, vector<128x128xbf16>, vector<8x128xf32> -> vector<8x128xf32>
    %34 = vector.extract_strided_slice %6 {offsets = [0, 256], sizes = [8, 128], strides = [1, 1]} : vector<8x384xf32> to vector<8x128xf32>
    %35 = math.tanh %34 : vector<8x128xf32>
    %36 = arith.mulf %35, %33 : vector<8x128xf32>
    %37 = arith.addf %0, %36 : vector<8x128xf32>
    %38 = vector.broadcast %19 : vector<8x1xf32> to vector<8x128xf32>
    %39 = arith.mulf %38, %37 : vector<8x128xf32>
    %40 = arith.mulf %39, %39 : vector<8x128xf32>
    %cst_14 = arith.constant dense<0.000000e+00> : vector<8xf32>
    %41 = vector.multi_reduction <add>, %40, %cst_14 [1] : vector<8x128xf32> to vector<8xf32>
    %42 = vector.shape_cast %41 : vector<8xf32> to vector<8x1xf32>
    %43 = math.sqrt %42 : vector<8x1xf32>
    %cst_15 = arith.constant 1.000000e+00 : f32
    %44 = vector.broadcast %cst_15 : f32 to vector<8x1xf32>
    %45 = arith.addf %44, %43 : vector<8x1xf32>
    %46 = tpu.reciprocal %45 {approx = true} : vector<8x1xf32> -> vector<8x1xf32>
    %cst_16 = arith.constant 1.600000e+01 : f32
    %47 = vector.broadcast %cst_16 : f32 to vector<8x1xf32>
    %48 = arith.mulf %47, %46 : vector<8x1xf32>
    %49 = vector.broadcast %48 : vector<8x1xf32> to vector<8x128xf32>
    %50 = arith.mulf %49, %39 : vector<8x128xf32>
    %51 = arith.truncf %50 : vector<8x128xf32> to vector<8x128xbf16>
    %c0_17 = arith.constant 0 : index
    %c0_18 = arith.constant 0 : index
    %52 = vector.load %arg5[%c0_17, %c0_18] : memref<128x128xbf16, #tpu.memory_space<vmem>>, vector<128x128xbf16>
    %cst_19 = arith.constant dense<0.000000e+00> : vector<8x128xf32>
    %53 = tpu.matmul %51, %52, %cst_19 {dimension_numbers = #tpu.dot_dimension_numbers<[1], [0], [0], [1], [0, 0, 1, 1], [], []>} : vector<8x128xbf16>, vector<128x128xbf16>, vector<8x128xf32> -> vector<8x128xf32>
    %c0_20 = arith.constant 0 : index
    %c0_21 = arith.constant 0 : index
    %54 = vector.load %arg6[%c0_20, %c0_21] : memref<8x128xf32, #tpu.memory_space<vmem>>, vector<8x128xf32>
    tpu.vector_store %arg6[%c0_20, %c0_21], %53 {strides = array<i32>} : memref<8x128xf32, #tpu.memory_space<vmem>>, vector<8x128xf32>,
    %c0_22 = arith.constant 0 : index
    %c0_23 = arith.constant 0 : index
    %55 = vector.load %arg7[%c0_22, %c0_23] : memref<8x128xf32, #tpu.memory_space<vmem>>, vector<8x128xf32>
    tpu.vector_store %arg7[%c0_22, %c0_23], %36 {strides = array<i32>} : memref<8x128xf32, #tpu.memory_space<vmem>>, vector<8x128xf32>,
    return
  }
  func.func @transform_0(%arg0: i32) -> (i32, i32) {
    %c0_i32 = arith.constant 0 : i32
    %c0_i32_0 = arith.constant 0 : i32
    return %arg0, %c0_i32 : i32, i32
  }
  func.func @transform_1(%arg0: i32) -> (i32, i32) {
    %c0_i32 = arith.constant 0 : i32
    %c0_i32_0 = arith.constant 0 : i32
    %c0_i32_1 = arith.constant 0 : i32
    return %c0_i32, %c0_i32_0 : i32, i32
  }
  func.func @transform_2(%arg0: i32) -> (i32, i32) {
    %c0_i32 = arith.constant 0 : i32
    %c0_i32_0 = arith.constant 0 : i32
    %c0_i32_1 = arith.constant 0 : i32
    return %c0_i32, %c0_i32_0 : i32, i32
  }
  func.func @transform_3(%arg0: i32) -> (i32, i32) {
    %c0_i32 = arith.constant 0 : i32
    %c0_i32_0 = arith.constant 0 : i32
    %c0_i32_1 = arith.constant 0 : i32
    return %c0_i32, %c0_i32_0 : i32, i32
  }
  func.func @transform_4(%arg0: i32) -> (i32, i32) {
    %c0_i32 = arith.constant 0 : i32
    %c0_i32_0 = arith.constant 0 : i32
    %c0_i32_1 = arith.constant 0 : i32
    return %c0_i32, %c0_i32_0 : i32, i32
  }
  func.func @transform_5(%arg0: i32) -> (i32, i32) {
    %c0_i32 = arith.constant 0 : i32
    %c0_i32_0 = arith.constant 0 : i32
    return %arg0, %c0_i32 : i32, i32
  }
  func.func @transform_6(%arg0: i32) -> (i32, i32) {
    %c0_i32 = arith.constant 0 : i32
    %c0_i32_0 = arith.constant 0 : i32
    return %arg0, %c0_i32 : i32, i32
  }
}

</mosaic_0001>

<bundles_post_ra>
// kernel: tpu_custom_call.1
= control target key start
LH: loop header
LB: loop body
LE: loop exit
PB: predicated region body
PF: predicated region fallthrough
CT: control target
= control target key end

     0   :  { %s1778_s0 = inlined_call_operand.hbm [shape: f32[16,128], index: 0, kind: input, shape index: {}]   ;;  %s1779_s1 = inlined_call_operand.hbm [shape: bf16[128,384], index: 1, kind: input, shape index: {}]   ;;  %s1780_s2 = inlined_call_operand.hbm [shape: f32[1,384], index: 2, kind: input, shape index: {}]   ;;  %s1781_s3 = inlined_call_operand.hbm [shape: bf16[128,128], index: 3, kind: input, shape index: {}]   ;;  %s1782_s4 = inlined_call_operand.hbm [shape: bf16[128,128], index: 4, kind: input, shape index: {}]   ;;  %s1783_s5 = inlined_call_operand.hbm [shape: f32[16,128], index: 5, kind: output, shape index: {0}]   ;;  %s1784_s6 = inlined_call_operand.hbm [shape: f32[16,128], index: 6, kind: output, shape index: {1}]  }
   0x1   :  { %1785 = sst [smem:[#allocation19_spill]] %s1779_s1 }
   0x2   :  { %12 = vsyncpa [#allocation3], 0 }
   0x3   :  { %14 = vsyncpa [#allocation3 + $0x1], 0 }
   0x4   :  { %15 = vsyncpa [#allocation6], 0 }
   0x5   :  { %16 = vsyncpa [#allocation9], 0 }
   0x6   :  { %17 = vsyncpa [#allocation4], 0 }
   0x7   :  { %19 = vsyncpa [#allocation4 + $0x1], 0 }
   0x8   :  { %20 = vsyncpa [#allocation13], 0 }
   0x9   :  { %22 = vsyncpa [#allocation13 + $0x1], 0  ;;  %s1569_s21 = smov 0   ;;  %s1571_s22 = smov 0  }
   0xa   :  { %s1573_s23 = smov 0   ;;  %s1575_s24 = smov 0  }
   0xb LB: > { %s1786_s1 = sld [smem:[#allocation19_spill]]  ;;  %s1593_s28 = sadd.s32 4294967295, %s1524_s24   ;;  %s1524_s24 = sphi %s1575_s24, %s1798_s24   ;;  %s1520_s23 = sphi %s1573_s23, %s1797_s23   ;;  %s1516_s22 = sphi %s1571_s22, %s1796_s22   ;;  %s1512_s21 = sphi %s1569_s21, %s1795_s21  }
   0xc   : > { %p938_p0 = scmp.ge.s32.totalorder %s1524_s24, 1  ;;  %p49_p1 = scmp.eq.s32.totalorder %s1593_s28, 0 }
   0xd   : > { %p195_p2 = scmp.lt.s32.totalorder %s1524_s24, 3  ;;  %s1526_s30 = smov [#allocation5]  }
   0xe   : > { %s208_s7 = sshll.u32 %s1526_s30, 4  ;;  %s232_s10 = sshll.u32 %s1781_s3, 4  ;;  %s209_s7 = int_to_ptr.vmem [resolvable:$true] %s208_s7  ;;  %s233_s10 = int_to_ptr.hbm [resolvable:$true] %s232_s10 }
   0xf   : > { %p1598_p3 = pnand %p938_p0, %p195_p2  ;;  %s1527_s12 = smov [#allocation8]  }
  0x10   : > { %s234_s13 = sshll.u32 %s1527_s12, 4  ;;  %s1528_s14 = smov 192   ;;  %s235_s13 = int_to_ptr.vmem [resolvable:$true] %s234_s13 }
  0x11   : > { %s206_s27 = sshll.u32 %s1786_s1, 4  ;;  %p1182_p4 = pneg %p1598_p3  ;;  %s207_s27 = int_to_ptr.hbm [resolvable:$true] %s206_s27 }
  0x12   : > { %s1529_s15 = smov 12   ;;  %s1530_s16 = smov 64  }
  0x13   : > { %p1610_p6 = pnand %p1182_p4, %p49_p1  ;;  %s1531_s17 = smov 4  }
  0x14   : > { %s221_s20 = sshll.u32 %s1780_s2, 4  ;;  %s1532_s25 = smov [#allocation7]   ;;  %s222_s20 = int_to_ptr.hbm [resolvable:$true] %s221_s20 }
  0x15   : > { %1185 = dma.hbm_to_vmem [thread:$0]  (!%p1610_p6), %s207_s27, 3072, %s209_s7, [#allocation6], %s1528_s14, %s1528_s14, %s1529_s15  }
  0x16   : > { %1191 = dma.hbm_to_vmem [thread:$0]  (!%p1610_p6), %s233_s10, 1024, %s235_s13, [#allocation9], %s1530_s16, %s1530_s16, %s1531_s17  }
  0x17   : > { %s223_s26 = sshll.u32 %s1532_s25, 4  ;;  %s246_s7 = sshll.u32 %s1782_s4, 4  ;;  %s224_s26 = int_to_ptr.vmem [resolvable:$true] %s223_s26  ;;  %s247_s7 = int_to_ptr.hbm [resolvable:$true] %s246_s7 }
  0x18   : > { %1188 = dma.hbm_to_vmem [thread:$0]  (!%p1610_p6), %s222_s20, 48, %s224_s26, [#allocation6]  }
  0x19   : > { %s1533_s8 = smov [#allocation10]   ;;  %s937_s10 = sadd.s32 4294967294, %s1524_s24  }
  0x1a   : > { %s248_s9 = sshll.u32 %s1533_s8, 4  ;;  %s1630_s12 = sadd.s32 1, %s1524_s24   ;;  %s249_s9 = int_to_ptr.vmem [resolvable:$true] %s248_s9 }
  0x1b   : > { %1194 = dma.hbm_to_vmem [thread:$0]  (!%p1610_p6), %s247_s7, 1024, %s249_s9, [#allocation9], %s1530_s16, %s1530_s16, %s1531_s17  }
  0x1c   : > { %s32_s13 = ssub.s32 %s1524_s24, %s1630_s12  ;;  %s35_s14 = sadd.s32 1, %s1520_s23 }
  0x1d   : > { %p33_p7 = scmp.eq.s32.totalorder %s32_s13, 0  ;;  %p42_p8 = scmp.ne.s32.totalorder %s1520_s23, %s1516_s22 }
  0x1e   : > { %p43_p9 = scmp.eq.s32.totalorder %s1524_s24, 0  ;;  %p48_p10 = scmp.ne.s32.totalorder %s1516_s22, %s1512_s21 }
  0x1f   : > { %s1641_s15 = scalar_select %p33_p7, %s1520_s23, %s35_s14  }
  0x20   : > { %p1643_p11 = por %p43_p9, %p42_p8  ;;  %p1649_p12 = por %p49_p1, %p48_p10 }
  0x21   : > { %p156_p13 = scmp.eq.s32.totalorder %s1593_s28, 1  ;;  %p162_p0 = scmp.eq.s32.totalorder %s937_s10, 1 }
  0x22   : > { %p1210_p2 = scmp.lt.s32.totalorder %s1524_s24, 2  ;;  %s262_s16 = sand.u32 1, %s1520_s23  }
  0x23   : > { %p1656_p4 = por %p156_p13, %p42_p8  ;;  %p1660_p6 = por %p162_p0, %p48_p10 }
  0x24   : > { %s944_s20 = sshll.u32 %s262_s16, 3  ;;  %s945_s25 = sshll.u32 %s1524_s24, 3 }
  0x25   : > { %s270_s30 = scalar_lea.hbm %s1778_s0, %s945_s25  ;;  %s266_s7 = scalar_lea.vmem [#allocation2], %s944_s20 }
  0x26   : > { %s274_s8 = sshll.u32 %s266_s7, 4  ;;  %s272_s9 = sshll.u32 %s270_s30, 4  ;;  %s275_s8 = int_to_ptr.vmem [resolvable:$true] %s274_s8  ;;  %s273_s9 = int_to_ptr.hbm [resolvable:$true] %s272_s9 }
  0x27   : > { %p1670_p7 = pnand %p1210_p2, %p1643_p11  ;;  %s263_s13 = scalar_lea.sflag [#allocation3], %s262_s16 }
  0x28   : > { %s1388_s14 = sshra.s32 %s273_s9, 4  ;;  %s1395_s26 = scalar_lea.hbm %s1778_s0, 16  ;;  %s1389_s14 = int_to_ptr.hbm [resolvable:$true] %s1388_s14 }
  0x29   : > { %s1390_s1 = scalar_lea.hbm %s1389_s14, 8  ;;  %p1392_p9 = pneg %p1670_p7 }
  0x2a   : > { %p1391_p8 = scmp.ne.s32.totalorder %s1389_s14, %s1390_s1  ;;  %p1396_p11 = scmp.lt.s32.totalorder %s1389_s14, %s1778_s0 }
  0x2b   : > { %p1397_p0 = scmp.lt.s32.totalorder %s1395_s26, %s1390_s1 }
  0x2c   : > { %p1393_p10 = pnand %p1392_p9, %p1391_p8 }
  0x2d   : > { %p1398_p2 = por %p1397_p0, %p1396_p11 }
  0x2e   : > { %p1394_p13 = pneg %p1393_p10 }
  0x30   : > { %p1399_p5 = pnand %p1398_p2, %p1394_p13 }
  0x32   : > { %1402 = shalt.err (!%p1399_p5)
}
  0x33   : > { %1198 = dma.hbm_to_vmem [thread:$0]  (!%p1670_p7), %s273_s9, 128, %s275_s8, %s263_s13  }
  0x34   : > { %283 = sbr.rel (%p1598_p3) target bundleno = 904 (0x388), region = 40  ;;  %s1687_s16 = sand.u32 (!%p1598_p3), 1, %s1516_s22  }
  0x35   : > { %s1690_s30 = sshll.u32 (!%p1598_p3), %s1687_s16, 3  ;;  %s286_s7 = scalar_lea.sflag (!%p1598_p3), [#allocation3], %s1687_s16 }
  0x36   : > { %s289_s1 = scalar_lea.vmem (!%p1598_p3), [#allocation2], %s1690_s30 }
  0x39   : > { %1491 = dma.done.wait (%p1649_p12), %s286_s7, 128  }
  0x3a   : > { %1493 = vsyncadd (%p1649_p12), %s286_s7, 4294967168 }
  0x3b   : > { %1495 = dma.done.wait (%p49_p1), [#allocation6], 3120  }
  0x3c   : > { %1497 = vsyncadd (%p49_p1), [#allocation6], 4294964176 }
  0x3d   : > { %1499 = dma.done.wait (%p49_p1), [#allocation9], 2048  }
  0x3e   : > { %1501 = vsyncadd (%p49_p1), [#allocation9], 4294965248  ;;  %v1141_v0 = vld [vmem:[#allocation5 + $0xac] sm:$0xf]  ;;  %v1042_v1 = vld [vmem:[#allocation5 + $0xb4] sm:$0xf0] }
  0x3f   : > { %v1138_v2 = vld [vmem:[#allocation5 + $0x94] sm:$0xf]  ;;  %v1045_v3 = vor.u32 %v1141_v0, %v1042_v1  ;;  %v1030_v4 = vld [vmem:[#allocation5 + $0x9c] sm:$0xf0]  ;;  %v1135_v6 = vld [vmem:[#allocation5 + $0x7c] sm:$0xf] }
  0x40   : > { %v1033_v5 = vor.u32 %v1138_v2, %v1030_v4  ;;  %v1018_v7 = vld [vmem:[#allocation5 + $0x84] sm:$0xf0]  ;;  %v1132_v9 = vld [vmem:[#allocation5 + $0x64] sm:$0xf]  ;;  %v1006_v10 = vld [vmem:[#allocation5 + $0x6c] sm:$0xf0] }
  0x41   : > { %527 = vmatpush.bf16.msra.mxu1 %v1045_v3  ;;  %v1021_v8 = vor.u32 %v1135_v6, %v1018_v7  ;;  %v1009_v11 = vor.u32 %v1132_v9, %v1006_v10  ;;  %v1129_v12 = vld [vmem:[#allocation5 + $0x4c] sm:$0xf]  ;;  %v994_v13 = vld [vmem:[#allocation5 + $0x54] sm:$0xf0]  ;;  %v1126_v15 = vld [vmem:[#allocation5 + $0x34] sm:$0xf] }
  0x42   : > { %v997_v14 = vor.u32 %v1129_v12, %v994_v13  ;;  %v982_v16 = vld [vmem:[#allocation5 + $0x3c] sm:$0xf0]  ;;  %v1123_v18 = vld [vmem:[#allocation5 + $0x1c] sm:$0xf]  ;;  %v970_v19 = vld [vmem:[#allocation5 + $0x24] sm:$0xf0] }
  0x43   : > { %v985_v17 = vor.u32 %v1126_v15, %v982_v16  ;;  %v973_v20 = vor.u32 %v1123_v18, %v970_v19  ;;  %v1120_v21 = vld [vmem:[#allocation5 + $0x4] sm:$0xf]  ;;  %v958_v22 = vld [vmem:[#allocation5 + $0xc] sm:$0xf0]  ;;  %v1040_v26 = vld [vmem:[#allocation5 + $0xa8] sm:$0xf] }
  0x44   : > { %v961_v23 = vor.u32 %v1120_v21, %v958_v22  ;;  %v1708_v24 = vld [vmem:[%s289_s1] sm:$0xff]  ;;  %v1136_v33 = vld [vmem:[#allocation5 + $0x80] sm:$0xf0]  ;;  %v1004_v35 = vld [vmem:[#allocation5 + $0x60] sm:$0xf]  ;;  %s343_s29 = scalar_lea.vmem [#allocation12], %s1690_s30 }
  0x45   : > { %528 = vmatpush.bf16.msra.mxu1 %v1033_v5  ;;  %v1712_v25 = vpack.c.bf16 %v1708_v24, %v1708_v24  ;;  %v1142_v27 = vld [vmem:[#allocation5 + $0xb0] sm:$0xf0]  ;;  %v1028_v28 = vld [vmem:[#allocation5 + $0x90] sm:$0xf]  ;;  %v1139_v30 = vld [vmem:[#allocation5 + $0x98] sm:$0xf0]  ;;  %v553_v55 = vmul.f32 %v1708_v24, %v1708_v24 }
  0x46   : > { %v1041_v29 = vor.u32 %v1142_v27, %v1040_v26  ;;  %v1029_v31 = vor.u32 %v1139_v30, %v1028_v28  ;;  %v1016_v32 = vld [vmem:[#allocation5 + $0x78] sm:$0xf]  ;;  %v1133_v36 = vld [vmem:[#allocation5 + $0x68] sm:$0xf0]  ;;  %v992_v38 = vld [vmem:[#allocation5 + $0x48] sm:$0xf] }
  0x47   : > { %v1017_v34 = vor.u32 %v1136_v33, %v1016_v32  ;;  %v1005_v37 = vor.u32 %v1133_v36, %v1004_v35  ;;  %v1130_v39 = vld [vmem:[#allocation5 + $0x50] sm:$0xf0]  ;;  %v980_v41 = vld [vmem:[#allocation5 + $0x30] sm:$0xf]  ;;  %v1127_v42 = vld [vmem:[#allocation5 + $0x38] sm:$0xf0]  ;;  %554 = vadd.xlane.f32.xlu1 %v553_v55 }
  0x48   : > { %514 = vmatpush.bf16.msra.mxu0 %v1041_v29  ;;  %v993_v40 = vor.u32 %v1130_v39, %v992_v38  ;;  %v1715_v43 = vld [vmem:[#allocation7] sm:$0x7]  ;;  %v981_v44 = vor.u32 %v1127_v42, %v980_v41  ;;  %v968_v45 = vld [vmem:[#allocation5 + $0x18] sm:$0xf]  ;;  %v1124_v46 = vld [vmem:[#allocation5 + $0x20] sm:$0xf0] }
  0x49   : > { %529 = vmatpush.bf16.msra.mxu1 %v1021_v8  ;;  %v381_v47 = vperm.slane %v1715_v43, 1  ;;  %v969_v48 = vor.u32 %v1124_v46, %v968_v45  ;;  %v956_v50 = vld [vmem:[#allocation5] sm:$0xf]  ;;  %v1121_v51 = vld [vmem:[#allocation5 + $0x8] sm:$0xf0]  ;;  %v1150_v1 = vld [vmem:[#allocation8 + $0x30] sm:$0xff] }
  0x4a   : > { %v957_v53 = vor.u32 %v1121_v51, %v956_v50  ;;  %v1048_v56 = vld [vmem:[#allocation5 + $0xb0] sm:$0xf]  ;;  %v1143_v57 = vld [vmem:[#allocation5 + $0xb8] sm:$0xf0]  ;;  %v1036_v58 = vld [vmem:[#allocation5 + $0x98] sm:$0xf] }
  0x4b   : > { %v1049_v59 = vor.u32 %v1143_v57, %v1048_v56  ;;  %v1140_v60 = vld [vmem:[#allocation5 + $0xa0] sm:$0xf0]  ;;  %v1151_v62 = vld [vmem:[#allocation8 + $0x38] sm:$0xff]  ;;  %v1137_v0 = vld [vmem:[#allocation5 + $0x88] sm:$0xf0]  ;;  %v380_v29 = vperm.slane %v1715_v43, 0 }
  0x4c   : > { %515 = vmatpush.bf16.msra.mxu0 %v1029_v31  ;;  %v1037_v61 = vor.u32 %v1140_v60, %v1036_v58  ;;  %v1024_v63 = vld [vmem:[#allocation5 + $0x80] sm:$0xf]  ;;  %645 = vmatpush.bf16.msra.mxu3 %v1151_v62  ;;  %v1012_v3 = vld [vmem:[#allocation5 + $0x68] sm:$0xf]  ;;  %v1134_v4 = vld [vmem:[#allocation5 + $0x70] sm:$0xf0] }
  0x4d   : > { %530 = vmatpush.bf16.msra.mxu1 %v1009_v11  ;;  %540 = vmatpush.bf16.msra.mxu2 %v1049_v59  ;;  %v1025_v2 = vor.u32 %v1137_v0, %v1024_v63  ;;  %v1149_v5 = vld [vmem:[#allocation8 + $0x28] sm:$0xff]  ;;  %v1013_v6 = vor.u32 %v1134_v4, %v1012_v3  ;;  %v1131_v8 = vld [vmem:[#allocation5 + $0x58] sm:$0xf0]  ;;  %v988_v10 = vld [vmem:[#allocation5 + $0x38] sm:$0xf]  ;;  %s1116_s11 = sshll.u32 %s1593_s28, 3 }
  0x4e   : > { %v1000_v7 = vld [vmem:[#allocation5 + $0x50] sm:$0xf]  ;;  %v1128_v11 = vld [vmem:[#allocation5 + $0x40] sm:$0xf0]  ;;  %v1125_v15 = vld [vmem:[#allocation5 + $0x28] sm:$0xf0]  ;;  %s791_s10 = scalar_lea.hbm %s1784_s6, %s1116_s11 }
  0x4f   : > { %v1001_v9 = vor.u32 %v1131_v8, %v1000_v7  ;;  %v989_v12 = vor.u32 %v1128_v11, %v988_v10  ;;  %v964_v19 = vld [vmem:[#allocation5 + $0x8] sm:$0xf]  ;;  %v1147_v28 = vld [vmem:[#allocation8 + $0x18] sm:$0xff]  ;;  %v1146_v33 = vld [vmem:[#allocation8 + $0x10] sm:$0xff]  ;;  %s793_s13 = sshll.u32 %s343_s29, 4  ;;  %s795_s14 = sshll.u32 %s791_s10, 4  ;;  %s794_s13 = int_to_ptr.vmem [resolvable:$true] %s793_s13  ;;  %s796_s14 = int_to_ptr.hbm [resolvable:$true] %s795_s14 }
  0x50   : > { %516 = vmatpush.bf16.msra.mxu0 %v1017_v34  ;;  %646 = vmatpush.bf16.msra.mxu3 %v1150_v1  ;;  %v1148_v27 = vld [vmem:[#allocation8 + $0x20] sm:$0xff]  ;;  %v1145_v34 = vld [vmem:[#allocation8 + $0x8] sm:$0xff]  ;;  %v1159_v60 = vld [vmem:[#allocation10 + $0x38] sm:$0xff]  ;;  %s767_s20 = scalar_lea.sflag [#allocation13], %s1687_s16  ;;  %s1432_s25 = sshra.s32 %s796_s14, 4  ;;  %s1433_s25 = int_to_ptr.hbm [resolvable:$true] %s1432_s25 }
  0x51   : > { %531 = vmatpush.bf16.msra.mxu1 %v997_v14  ;;  %541 = vmatpush.bf16.msra.mxu2 %v1037_v61  ;;  %v976_v14 = vld [vmem:[#allocation5 + $0x20] sm:$0xf]  ;;  %v1144_v35 = vld [vmem:[#allocation8] sm:$0xff]  ;;  %v1158_v61 = vld [vmem:[#allocation10 + $0x30] sm:$0xff]  ;;  %s1434_s26 = scalar_lea.hbm %s1433_s25, 8  ;;  %s1438_s28 = scalar_lea.hbm %s1784_s6, 16 }
  0x52   : > { %v977_v18 = vor.u32 %v1125_v15, %v976_v14  ;;  %v1157_v62 = vld [vmem:[#allocation10 + $0x28] sm:$0xff]  ;;  %v1156_v63 = vld [vmem:[#allocation10 + $0x20] sm:$0xff]  ;;  %v1155_v0 = vld [vmem:[#allocation10 + $0x18] sm:$0xff]  ;;  %p1435_p1 = scmp.ne.s32.totalorder %s1433_s25, %s1434_s26  ;;  %p1439_p12 = scmp.lt.s32.totalorder %s1433_s25, %s1784_s6 }
  0x53   : > { %v1154_v1 = vld [vmem:[#allocation10 + $0x10] sm:$0xff]  ;;  %p1440_p7 = scmp.lt.s32.totalorder %s1438_s28, %s1434_s26 }
  0x54   : > { %517 = vmatpush.bf16.msra.mxu0 %v1005_v37  ;;  %647 = vmatpush.bf16.msra.mxu3 %v1149_v5  ;;  %p1436_p3 = pnand %p1435_p1, %p1656_p4 }
  0x55   : > { %532 = vmatpush.bf16.msra.mxu1 %v985_v17  ;;  %542 = vmatpush.bf16.msra.mxu2 %v1025_v2  ;;  %v1152_v2 = vld [vmem:[#allocation10] sm:$0xff]  ;;  %p1441_p8 = por %p1440_p7, %p1439_p12 }
  0x56   : > { %p1437_p5 = pneg %p1436_p3 }
  0x58   : > { %518 = vmatpush.bf16.msra.mxu0 %v993_v40  ;;  %648 = vmatpush.bf16.msra.mxu3 %v1148_v27  ;;  %p1442_p9 = pnand %p1441_p8, %p1437_p5 }
  0x59   : > { %533 = vmatpush.bf16.msra.mxu1 %v973_v20  ;;  %543 = vmatpush.bf16.msra.mxu2 %v1013_v6  ;;  %v1122_v20 = vld [vmem:[#allocation5 + $0x10] sm:$0xf0] }
  0x5a   : > { %v965_v21 = vor.u32 %v1122_v20, %v964_v19 }
  0x5c   : > { %519 = vmatpush.bf16.msra.mxu0 %v981_v44  ;;  %649 = vmatpush.bf16.msra.mxu3 %v1147_v28 }
  0x5d   : > { %534 = vmatpush.bf16.msra.mxu1 %v961_v23  ;;  %544 = vmatpush.bf16.msra.mxu2 %v1001_v9 }
  0x60   : > { %535 = vmatmul.bf16.vlgmr.msra.gmra.mxu1 %v1712_v25  ;;  %520 = vmatpush.bf16.msra.mxu0 %v969_v48 }
  0x61   : > { %545 = vmatpush.bf16.msra.mxu2 %v989_v12  ;;  %650 = vmatpush.bf16.msra.mxu3 %v1146_v33 }
  0x64   : > { %521 = vmatpush.bf16.msra.mxu0 %v957_v53 }
  0x65   : > { %546 = vmatpush.bf16.msra.mxu2 %v977_v18  ;;  %651 = vmatpush.bf16.msra.mxu3 %v1145_v34 }
  0x67   : > { %522 = vmatmul.bf16.vlgmr.msra.gmra.mxu0 %v1712_v25 }
  0x68   : > { %746 = vmatpush.bf16.msrb.mxu0 %v1159_v60 }
  0x69   : > { %547 = vmatpush.bf16.msra.mxu2 %v965_v21  ;;  %652 = vmatpush.bf16.msra.mxu3 %v1144_v35 }
  0x6c   : > { %548 = vmatmul.bf16.vlgmr.msra.gmra.mxu2 %v1712_v25  ;;  %747 = vmatpush.bf16.msrb.mxu0 %v1158_v61 }
  0x70   : > { %748 = vmatpush.bf16.msrb.mxu0 %v1157_v62 }
  0x74   : > { %749 = vmatpush.bf16.msrb.mxu0 %v1156_v63 }
  0x78   : > { %750 = vmatpush.bf16.msrb.mxu0 %v1155_v0 }
  0x7c   : > { %751 = vmatpush.bf16.msrb.mxu0 %v1154_v1 }
  0xba   : > { %v555_v31 = vpop.xlane.xlu1 %554 }
  0xdd   : > { %v536_v49 = vpop.f32.mrf.mxu1 }
  0xde   : > { %v537_v52 = vadd.f32 %v536_v49, %v381_v47  ;;  %v382_v47 = vperm.slane %v1715_v43, 2 }
  0xe0   : > { %571 = vmax.xlane.f32.xlu0 %v537_v52 }
  0xe4   : > { %v523_v23 = vpop.f32.mrf.mxu0 }
  0xe5   : > { %v538_v54 = vpop.f32.mrf.mxu1  ;;  %v524_v30 = vadd.f32 %v523_v23, %v380_v29 }
  0xe7   : > { %v556_v32 = vadd.f32 %v555_v31, %v524_v30 }
  0xe9   : > { %557 = vmin.xlane.f32.xlu1 %v556_v32 }
  0xec   : > { %v525_v26 = vpop.f32.mrf.mxu0 }
  0xef   : > { %v549_v39 = vpop.f32.mrf.mxu2 }
  0xf0   : > { %v550_v49 = vadd.f32 %v549_v39, %v382_v47 }
  0xf7   : > { %v551_v40 = vpop.f32.mrf.mxu2 }
 0x153   : > { %v572_v13 = vpop.xlane.xlu0 %571 }
 0x154   : > { %v573_v16 = vsub.f32 %v537_v52, %v572_v13 }
 0x156   : > { %v574_v17 = vmul.f32 1.442695, %v573_v16 }
 0x158   : > { %1256 = vpow2.f32 %v574_v17 }
 0x15c   : > { %v558_v41 = vpop.xlane.xlu1 %557 }
 0x15d   : > { %v559_v42 = vmax.f32 %v558_v41, 1e-12 }
 0x15e   : > { %v1257_v22 = vpop.eup %1256 }
 0x15f   : > { %576 = vadd.xlane.f32.xlu0 %v1257_v22  ;;  %vm566_vm0 = vweird.f32 %v559_v42 }
 0x1d2   : > { %v577_v36 = vpop.xlane.xlu0 %576 }
 0x1d3   : > { %1258 = vrcp.f32 %v577_v36 }
 0x1d4   : > { %1260 = vrsqrt.f32 %v559_v42 }
 0x1d5   : > { %1262 = vtanh.f32 %v550_v49 }
 0x1d9   : > { %v1259_v25 = vpop.eup %1258 }
 0x1da   : > { %v579_v37 = vmul.f32 %v1259_v25, %v1257_v22  ;;  %v1261_v44 = vpop.eup %1260 }
 0x1db   : > { %v561_v45 = vmul.f32 %v1261_v44, %v559_v42  ;;  %vm567_vm1 = vweird.f32 %v1261_v44  ;;  %v1263_v52 = vpop.eup %1262 }
 0x1dc   : > { %v580_v38 = vpack.c.bf16 %v579_v37, %v579_v37  ;;  %vm568_vm2 = vmor %vm566_vm0, %vm567_vm1 }
 0x1dd   : > { %v562_v46 = vmul.f32 %v1261_v44, %v561_v45 }
 0x1de   : > { %653 = vmatmul.bf16.vlgmr.msra.gmra.mxu3 %v580_v38 }
 0x1df   : > { %v563_v48 = vmul.f32 0.5, %v562_v46 }
 0x1e1   : > { %v564_v50 = vsub.f32 1.5, %v563_v48 }
 0x1e3   : > { %v565_v51 = vmul.f32 %v1261_v44, %v564_v50 }
 0x1e5   : > { %v569_v54 = vsel %vm568_vm2, %v1261_v44, %v565_v51 }
 0x1e6   : > { %v570_v57 = vmul.f32 10.0, %v569_v54 }
 0x261   : > { %v654_v53 = vpop.f32.mrf.mxu3 }
 0x262   : > { %v659_v55 = vmul.f32 %v1263_v52, %v654_v53 }
 0x264   : > { %v660_v56 = vadd.f32 %v659_v55, %v1708_v24  ;;  %760 = vst [vmem:[%s343_s29] sm:$0xff] %v659_v55  ;;  %v1153_v24 = vld [vmem:[#allocation10 + $0x8] sm:$0xff] }
 0x265   : > { %752 = vmatpush.bf16.msrb.mxu0 %v1153_v24 }
 0x266   : > { %v661_v58 = vmul.f32 %v660_v56, %v570_v57 }
 0x268   : > { %v662_v43 = vmul.f32 %v661_v58, %v661_v58 }
 0x269   : > { %v656_v59 = vpop.f32.mrf.mxu3  ;;  %753 = vmatpush.bf16.msrb.mxu0 %v1152_v2 }
 0x26a   : > { %663 = vadd.xlane.f32.xlu2 %v662_v43 }
 0x2dd   : > { %v664_v3 = vpop.xlane.xlu2 %663 }
 0x2de   : > { %1264 = vrsqrt.f32 %v664_v3  ;;  %vm672_vm3 = vcmp.eq.f32.partialorder %v664_v3, inf  ;;  %v675_v11 = vand.u32 2147483648, %v664_v3  ;;  %vm674_vm4 = vcmp.eq.f32.partialorder %v664_v3, 0.0 }
 0x2e4   : > { %v1265_v4 = vpop.eup %1264 }
 0x2e5   : > { %v666_v5 = vmul.f32 %v1265_v4, %v664_v3 }
 0x2e7   : > { %v667_v6 = vmul.f32 %v1265_v4, %v666_v5 }
 0x2e9   : > { %v668_v7 = vmul.f32 0.5, %v667_v6 }
 0x2eb   : > { %v669_v8 = vsub.f32 1.5, %v668_v7 }
 0x2ed   : > { %v670_v9 = vmul.f32 %v1265_v4, %v669_v8 }
 0x2ef   : > { %v671_v10 = vmul.f32 %v670_v9, %v664_v3 }
 0x2f1   : > { %v673_v12 = vsel %vm672_vm3, %v664_v3, %v671_v10 }
 0x2f2   : > { %v676_v13 = vsel %vm674_vm4, %v675_v11, %v673_v12 }
 0x2f3   : > { %v677_v14 = vadd.f32 1.0, %v676_v13 }
 0x2f5   : > { %1266 = vrcp.f32 %v677_v14 }
 0x2fb   : > { %v1267_v15 = vpop.eup %1266 }
 0x2fc   : > { %v679_v16 = vmul.f32 16.0, %v1267_v15 }
 0x2fe   : > { %v680_v17 = vmul.f32 %v679_v16, %v661_v58 }
 0x300   : > { %v681_v18 = vpack.c.bf16 %v680_v17, %v680_v17 }
 0x302   : > { %754 = vmatmul.bf16.vlgmr.msrb.gmra.mxu0 %v681_v18 }
 0x303   : > { %1445 = shalt.err (!%p1442_p9)
}
 0x304   : > { %1179 = dma.vmem_to_hbm [thread:$0]  (%p1656_p4), %s794_s13, 128, %s796_s14, %s767_s20  }
 0x305   : > { %s777_s9 = scalar_lea.hbm %s1783_s5, %s1116_s11  ;;  %s336_s10 = scalar_lea.vmem [#allocation11], %s1690_s30 }
 0x306   : > { %s779_s27 = sshll.u32 %s336_s10, 4  ;;  %s781_s18 = sshll.u32 %s777_s9, 4  ;;  %s780_s27 = int_to_ptr.vmem [resolvable:$true] %s779_s27  ;;  %s782_s18 = int_to_ptr.hbm [resolvable:$true] %s781_s18 }
 0x307   : > { %s762_s25 = scalar_lea.sflag [#allocation4], %s1687_s16  ;;  %s1460_s26 = sshra.s32 %s782_s18, 4  ;;  %s1461_s26 = int_to_ptr.hbm [resolvable:$true] %s1460_s26 }
 0x308   : > { %s1462_s28 = scalar_lea.hbm %s1461_s26, 8  ;;  %s1466_s20 = scalar_lea.hbm %s1783_s5, 16 }
 0x309   : > { %p1463_p10 = scmp.ne.s32.totalorder %s1461_s26, %s1462_s28  ;;  %p1467_p0 = scmp.lt.s32.totalorder %s1461_s26, %s1783_s5 }
 0x30a   : > { %p1468_p2 = scmp.lt.s32.totalorder %s1466_s20, %s1462_s28 }
 0x30b   : > { %p1464_p13 = pnand %p1463_p10, %p1656_p4 }
 0x30c   : > { %p1469_p1 = por %p1468_p2, %p1467_p0 }
 0x30d   : > { %p1465_p11 = pneg %p1464_p13 }
 0x30f   : > { %p1470_p3 = pnand %p1469_p1, %p1465_p11 }
 0x37f   : > { %v755_v19 = vpop.f32.mrf.mxu0 }
 0x380   : > { %759 = vst [vmem:[%s336_s10] sm:$0xff] %v755_v19 }
 0x381   : > { %1473 = shalt.err (!%p1470_p3)
}
 0x382   : > { %1178 = dma.vmem_to_hbm [thread:$0]  (%p1656_p4), %s780_s27, 128, %s782_s18, %s762_s25  }
 0x387   : > { %v757_v20 = vpop.f32.mrf.mxu0 }
 0x388 PF: > { %s807_s16 = sand.u32 1, %s1512_s21   ;;  %p1794_p5 = scmp.ge.s32.totalorder %s1524_s24, 2 }
 0x389   : > { %s808_s7 = scalar_lea.sflag [#allocation4], %s807_s16 }
 0x38a   : > { %p1200_p12 = pnand %p1794_p5, %p1660_p6 }
 0x38c   : > { %p1201_p7 = pneg %p1200_p12 }
 0x38e   : > { %1503 = dma.done.wait (%p1201_p7), %s808_s7, 128  }
 0x38f   : > { %1505 = vsyncadd (%p1201_p7), %s808_s7, 4294967168  ;;  %s818_s1 = scalar_lea.sflag [#allocation13], %s807_s16 }
 0x390   : > { %1507 = dma.done.wait (%p1201_p7), %s818_s1, 128  }
 0x391   : > { %1509 = vsyncadd (%p1201_p7), %s818_s1, 4294967168  ;;  %p25_p4 = scmp.ge.s32.totalorder %s1630_s12, 4   ;;  %s1795_s21 = smov %s1516_s22 }
 0x392   : > { %s1796_s22 = smov %s1520_s23  ;;  %s1797_s23 = smov %s1641_s15 }
 0x393   : > { %s1798_s24 = smov %s1630_s12  ;;  %27 = sbr.rel (!%p25_p4) target bundleno = 11 (0xb), region = 118 }
 0x398   :  { %824 = vsyncpa [#allocation3], 1 }
 0x399   :  { %826 = vsyncpa [#allocation3 + $0x1], 1 }
 0x39a   :  { %827 = vsyncpa [#allocation6], 1 }
 0x39b   :  { %828 = vsyncpa [#allocation9], 1 }
 0x39c   :  { %829 = vsyncpa [#allocation4], 1 }
 0x39d   :  { %831 = vsyncpa [#allocation4 + $0x1], 1 }
 0x39e   :  { %832 = vsyncpa [#allocation13], 1 }
 0x39f   :  { %834 = vsyncpa [#allocation13 + $0x1], 1 }

</bundles_post_ra>
